<compile_context>
chip_gen: v7x
topology: tpu7x:2x2x1
jax: 0.10.0
libtpu: 0.0.40
codegen_flags: <defaults>
</compile_context>

<pallas_src>
import jax
import jax.numpy as jnp
from jax.experimental import pallas as pl
from jax.experimental.pallas import tpu as pltpu


def _dma_identity_kernel(x_hbm, o_hbm, sem):
    # Entire UNO forward pass: one DMA-engine HBM->HBM copy.
    cp = pltpu.make_async_copy(x_hbm, o_hbm, sem)
    cp.start()
    cp.wait()


def _identity_copy_dma(feature):
    """Materialized identity via a single direct HBM->HBM DMA (no VMEM bounce)."""
    nbytes = feature.size * jnp.dtype(feature.dtype).itemsize
    return pl.pallas_call(
        _dma_identity_kernel,
        out_shape=jax.ShapeDtypeStruct(feature.shape, feature.dtype),
        in_specs=[pl.BlockSpec(memory_space=pl.ANY)],
        out_specs=pl.BlockSpec(memory_space=pl.ANY),
        scratch_shapes=[pltpu.SemaphoreType.DMA],
        cost_estimate=pl.CostEstimate(
            flops=0,
            transcendentals=0,
            bytes_accessed=2 * nbytes,
        ),
    )(feature)


def uno_forward(feature, _m):
    """JAX equivalent of UNO.forward(feature, _m) == feature.

    UNO is a parameter-free identity, so the fastest correct implementation is
    to return `feature` unchanged (no pallas_call, zero HBM traffic)."""
    del _m  # ignored, matching the PyTorch module
    return feature


def uno_forward_materialized(feature, _m):
    """Identity via an optimized Pallas TPU copy (single HBM->HBM DMA), for
    callers that need a freshly materialized output buffer.  Otherwise prefer
    `uno_forward`."""
    del _m
    return _identity_copy_dma(feature)


if __name__ == "__main__":
    key = jax.random.PRNGKey(0)
    k_feat, k_m, k_odd = jax.random.split(key, 3)

    # Small shapes consistent with a conv-feature input: NCHW = (2, 4, 16, 16)
    feature = jax.random.normal(k_feat, (2, 4, 16, 16), dtype=jnp.float32)
    _m = jax.random.normal(k_m, (2, 1, 16, 16), dtype=jnp.float32)

    # Fast path: semantically exact (and fastest) answer — pure identity.
    out_fast = jax.block_until_ready(uno_forward(feature, _m))

    # Pallas path: materialized identity via direct HBM->HBM DMA.
    out = jax.block_until_ready(uno_forward_materialized(feature, _m))

    assert out.shape == feature.shape and out.dtype == feature.dtype
    assert bool(jnp.array_equal(out, feature))
    assert bool(jnp.array_equal(out_fast, feature))

    # Ragged / non-lane-aligned element count: DMA path needs no pad or slice.
    odd = jax.random.normal(k_odd, (3, 5, 7), dtype=jnp.float32)
    out_odd = jax.block_until_ready(uno_forward_materialized(odd, None))
    assert out_odd.shape == odd.shape and bool(jnp.array_equal(out_odd, odd))

    print("KERNEL_OK")
</pallas_src>

<mosaic_0001>
module attributes {stable_mosaic.version = 11 : i64} {
  func.func @_dma_identity_kernel(%arg0: memref<2x4x16x16xf32, #tpu.memory_space<any>>, %arg1: memref<2x4x16x16xf32, #tpu.memory_space<any>>, %arg2: memref<!tpu.dma_semaphore, #tpu.memory_space<semaphore_mem>>) attributes {dimension_semantics = [], scalar_prefetch = 0 : i64, scratch_operands = 1 : i64, tpu.core_type = #tpu.core_type<tc>} {
    tpu.enqueue_dma source(%arg0 : memref<2x4x16x16xf32, #tpu.memory_space<any>>) target(%arg1 : memref<2x4x16x16xf32, #tpu.memory_space<any>>) target_semaphore(%arg2 : memref<!tpu.dma_semaphore, #tpu.memory_space<semaphore_mem>>)
    tpu.wait_dma2 semaphore(%arg2 : memref<!tpu.dma_semaphore, #tpu.memory_space<semaphore_mem>>) src(%arg0 : memref<2x4x16x16xf32, #tpu.memory_space<any>>) dst(%arg1 : memref<2x4x16x16xf32, #tpu.memory_space<any>>)
    return
  }
}

</mosaic_0001>

<bundles_post_ra>
// kernel: tpu_custom_call.1
= control target key start
LH: loop header
LB: loop body
LE: loop exit
PB: predicated region body
PF: predicated region fallthrough
CT: control target
= control target key end

     0   :  { %s36_s6 = smov [#allocation2]   ;;  %s37_s7 = smov [#allocation3]   ;;  %s55_s0 = inlined_call_operand.hbm [shape: f32[2,4,16,16], index: 0, kind: input, shape index: {}]   ;;  %s56_s1 = inlined_call_operand.hbm [shape: f32[2,4,16,16], index: 1, kind: output, shape index: {}]  }
   0x1   :  { %s38_s8 = smov 0  }
   0x2   :  { %18 = dma.general %s55_s0, 2048, %s56_s1, %s36_s6, %s37_s7, [#allocation4], %s38_s8, 0  }
   0x3   :  { %34 = dma.done.wait [#allocation2], 2048 }
   0x4   :  { %35 = vsyncadd [#allocation2], 4294965248 }
   0x5   :  { %24 = vsyncmov [#allocation2] }
   0x8   :  { %s25_s13 = vpop.sfrf %24 }
   0x9   :  { %p30_p0 = scmp.ne.s32.totalorder %s25_s13, 0 }
   0xb   :  { %29 = shalt.err (%p30_p0)  }

</bundles_post_ra>
